<compile_context>
chip_gen: v7x
topology: tpu7x:2x2x1
jax: 0.10.0
libtpu: 0.0.40
codegen_flags: <defaults>
</compile_context>

<pallas_src>
import functools

import jax
import jax.numpy as jnp
from jax.experimental import pallas as pl
from jax.experimental.pallas import tpu as pltpu

BN_EPS = 1e-5
NEG_SLOPE = 0.2
LANE = 128
MAX_TK = 2048  # K-tile cap: keeps double-buffered bf16 x/w1 tiles well inside the
               # 32 MiB scoped-VMEM default on every generation (incl. v7x, 64 MiB phys).


def _round_up(x, m):
    return (x + m - 1) // m * m


def choose_tk(snp_len):
    """Default K tile: the whole (128-padded) K dim, capped at MAX_TK."""
    if snp_len <= LANE:
        return snp_len
    return min(MAX_TK, _round_up(snp_len, LANE))


def _fused_mlp_kernel(x_ref, w1_ref, w2_ref, p_ref, o_ref, acc_ref):
    """K-tiled fused forward.  grid = (nk,) over snp_len ('arbitrary').

    Packed-param slab p_ref, shape (6, h1), f32 (h2-sized rows zero-padded to h1):
      row 0: gamma1   row 1: beta1
      row 2: gamma2   row 3: beta2
      row 4: fc3 weight row
      row 5: fc3 bias (lane 0)
    """
    k = pl.program_id(0)

    @pl.when(k == 0)
    def _init():
        acc_ref[...] = jnp.zeros_like(acc_ref)

    # fc1 contraction: stream (B, tk) x (tk, h1) bf16 tiles, accumulate in f32.
    acc_ref[...] += jnp.dot(x_ref[...], w1_ref[...],
                            preferred_element_type=jnp.float32)

    @pl.when(k == pl.num_programs(0) - 1)
    def _finish():
        p = p_ref[...]
        g1, bt1 = p[0:1, :], p[1:2, :]
        g2, bt2 = p[2:3, :], p[3:4, :]
        w3_row = p[4:5, :]
        b3 = p[5:6, 0:1]

        def bn_lrelu(h, g, bt):
            # Training-mode BatchNorm1d (biased batch variance) folded into one FMA.
            # Kept in f32 on all generations (v5e has no bf16 VPU/EUP); rsqrt -> EUP.
            mean = jnp.mean(h, axis=0, keepdims=True)
            diff = h - mean
            var = jnp.mean(diff * diff, axis=0, keepdims=True)
            scale = g * jax.lax.rsqrt(var + BN_EPS)
            shift = bt - mean * scale
            h = h * scale + shift
            return jnp.where(h >= 0, h, NEG_SLOPE * h)

        h = bn_lrelu(acc_ref[...], g1, bt1)

        # fc2: bf16 MXU operands, f32 accumulation. Zero-padded output columns stay 0.
        h = jnp.dot(h.astype(jnp.bfloat16), w2_ref[...],
                    preferred_element_type=jnp.float32)
        h = bn_lrelu(h, g2, bt2)

        # fc3: (B, h1) . (h1,) -> (B, 1) as VPU multiply + cross-lane (XLU) reduce;
        # zero-padded lanes h2..h1 contribute exactly 0.
        o_ref[...] = jnp.sum(h * w3_row, axis=-1, keepdims=True) + b3


@functools.partial(jax.jit, static_argnames=("tk",))
def model_forward(data, w1, w2, packed, *, tk):
    """Forward pass of `Model`.  `target` from the PyTorch signature is unused.

    data:   (B, snp_len) f32  (zero-padded along K and cast to bf16 here)
    w1:     (k_pad, h1)  bf16 (already K-padded; stored transposed as (in, out))
    w2:     (h1, h1)     bf16 (output columns h2..h1 zero-padded)
    packed: (6, h1)      f32  per-feature parameter slab
    """
    B, snp_len = data.shape
    k_pad, h1 = w1.shape
    assert k_pad % tk == 0, (k_pad, tk)
    nk = k_pad // tk

    # Zero-pad K and cast the streamed MXU operand to bf16 (zero cols add 0 to the dot).
    x = jnp.pad(data, ((0, 0), (0, k_pad - snp_len))).astype(jnp.bfloat16)

    grid_spec = pltpu.PrefetchScalarGridSpec(
        num_scalar_prefetch=0,
        grid=(nk,),
        in_specs=[
            # Streamed along the K axis (double-buffered by the Pallas pipeline).
            pl.BlockSpec((B, tk), lambda k: (0, k)),
            pl.BlockSpec((tk, h1), lambda k: (k, 0)),
            # Small blocks with constant index maps -> fetched once, stay resident.
            pl.BlockSpec((h1, h1), lambda k: (0, 0)),
            pl.BlockSpec((6, h1), lambda k: (0, 0)),
        ],
        out_specs=pl.BlockSpec((B, 1), lambda k: (0, 0)),
        scratch_shapes=[pltpu.VMEM((B, h1), jnp.float32)],
    )

    return pl.pallas_call(
        _fused_mlp_kernel,
        out_shape=jax.ShapeDtypeStruct((B, 1), jnp.float32),
        grid_spec=grid_spec,
        compiler_params=pltpu.CompilerParams(
            # Single reduction (K) axis: must be 'arbitrary' so the fc1 accumulator
            # and the output block stay resident across it.
            dimension_semantics=("arbitrary",),
            # MAX_TK keeps double-buffered bf16 x/w1 tiles well inside this budget,
            # which is valid on v5e/v6e (128 MiB VMEM) and v7x (64 MiB VMEM).
            vmem_limit_bytes=32 * 1024 * 1024,
        ),
    )(x, w1, w2, packed)


def init_params(key, snp_len, base_node):
    """PyTorch-style parameter set (weights stored transposed as (in, out))."""
    h1 = base_node * 2
    h2 = base_node
    k = jax.random.split(key, 6)
    w1 = jax.random.normal(k[0], (snp_len, h1), jnp.float32) * (1.0 / jnp.sqrt(snp_len))
    b1 = jax.random.normal(k[1], (1, h1), jnp.float32) * 0.01
    g1 = jnp.ones((1, h1), jnp.float32)           # BN1 weight (gamma)
    bt1 = jnp.zeros((1, h1), jnp.float32)         # BN1 bias  (beta)

    w2 = jax.random.normal(k[2], (h1, h2), jnp.float32) * (1.0 / jnp.sqrt(h1))
    b2 = jax.random.normal(k[3], (1, h2), jnp.float32) * 0.01
    g2 = jnp.ones((1, h2), jnp.float32)
    bt2 = jnp.zeros((1, h2), jnp.float32)

    w3 = jax.random.normal(k[4], (h2, 1), jnp.float32) * (1.0 / jnp.sqrt(h2))
    b3 = jax.random.normal(k[5], (1, 1), jnp.float32) * 0.01
    return (w1, b1, g1, bt1, w2, b2, g2, bt2, w3, b3)


def prepare_params(params, *, tk):
    """Pad / pack / cast the PyTorch-style params for the kernel:
       * drop b1/b2 (a Linear bias followed by batch-stat BatchNorm cancels exactly),
       * zero-pad the h2 feature dim up to h1 (padded lanes contribute exactly 0),
       * zero-pad w1's K dim to a multiple of tk,
       * cast MXU operands (w1, w2) to bf16; keep the per-feature slab in f32.
    """
    (w1, b1, g1, bt1, w2, b2, g2, bt2, w3, b3) = params
    del b1, b2
    snp_len, h1 = w1.shape
    h2 = w2.shape[1]

    k_pad = _round_up(snp_len, tk)
    w1p = jnp.pad(w1, ((0, k_pad - snp_len), (0, 0))).astype(jnp.bfloat16)
    w2p = jnp.pad(w2, ((0, 0), (0, h1 - h2))).astype(jnp.bfloat16)

    def row(v):
        v = v.reshape(-1).astype(jnp.float32)
        return jnp.pad(v, (0, h1 - v.shape[0]))

    packed = jnp.stack([row(g1), row(bt1), row(g2), row(bt2), row(w3), row(b3)], axis=0)
    return w1p, w2p, packed


def reference_forward(data, params, *, mxu_dtype=jnp.float32):
    """Pure-JAX reference of the original PyTorch math (biases included — they cancel
    under batch-stat BN, which the asserts below verify)."""
    (w1, b1, g1, bt1, w2, b2, g2, bt2, w3, b3) = params

    def dot(a, b):
        return jnp.dot(a.astype(mxu_dtype), b.astype(mxu_dtype),
                       preferred_element_type=jnp.float32)

    def block(h, w, b, g, bt):
        h = dot(h, w) + b
        m = jnp.mean(h, axis=0, keepdims=True)
        v = jnp.mean((h - m) ** 2, axis=0, keepdims=True)
        h = (h - m) / jnp.sqrt(v + BN_EPS) * g + bt
        return jnp.where(h >= 0, h, NEG_SLOPE * h)

    h = block(data, w1, b1, g1, bt1)
    h = block(h, w2, b2, g2, bt2)
    return dot(h, w3) + b3


if __name__ == "__main__":
    key = jax.random.PRNGKey(0)
    k_data, k_param = jax.random.split(key)

    batch = 16
    snp_len = 500      # deliberately not a multiple of 128: exercises K zero-padding
    base_node = 32     # h1 = 64, h2 = 32
    tk = 128           # force 4 K grid steps at these toy shapes (choose_tk would pick 512)

    data = jax.random.normal(k_data, (batch, snp_len), jnp.float32)
    params = init_params(k_param, snp_len, base_node)
    # `target` (second argument of Model.forward) is unused by the module -> not built.

    w1p, w2p, packed = prepare_params(params, tk=tk)
    out = model_forward(data, w1p, w2p, packed, tk=tk)
    out = jax.block_until_ready(out)
    assert out.shape == (batch, 1), out.shape

    # Tight check vs. a reference using the same bf16 MXU operands / f32 accumulation.
    ref_bf16 = reference_forward(data, params, mxu_dtype=jnp.bfloat16)
    assert jnp.allclose(out, ref_bf16, atol=2e-3, rtol=2e-3), float(
        jnp.max(jnp.abs(out - ref_bf16)))

    # Loose check vs. the full-f32 PyTorch math (difference is bf16 matmul rounding only).
    ref_f32 = reference_forward(data, params, mxu_dtype=jnp.float32)
    assert jnp.allclose(out, ref_f32, atol=5e-2, rtol=5e-2), float(
        jnp.max(jnp.abs(out - ref_f32)))

    print("KERNEL_OK")
</pallas_src>

<mosaic_0001>
module attributes {stable_mosaic.version = 11 : i64} {
  func.func @_fused_mlp_kernel(%arg0: i32, %arg1: memref<16x128xbf16, #tpu.memory_space<vmem>>, %arg2: memref<128x64xbf16, #tpu.memory_space<vmem>>, %arg3: memref<64x64xbf16, #tpu.memory_space<vmem>>, %arg4: memref<6x64xf32, #tpu.memory_space<vmem>>, %arg5: memref<16x1xf32, #tpu.memory_space<vmem>>, %arg6: memref<16x64xf32, #tpu.memory_space<vmem>>) attributes {dimension_semantics = [#tpu.dimension_semantics<arbitrary>], iteration_bounds = array<i64: 4>, scalar_prefetch = 0 : i64, scratch_operands = 1 : i64, tpu.core_type = #tpu.core_type<tc>, window_params = [{transform_indices = @transform_0, window_bounds = array<i64: 16, 128>}, {transform_indices = @transform_1, window_bounds = array<i64: 128, 64>}, {pipeline_mode = #tpu.pipeline_mode<synchronous>, transform_indices = @transform_2, window_bounds = array<i64: 64, 64>}, {pipeline_mode = #tpu.pipeline_mode<synchronous>, transform_indices = @transform_3, window_bounds = array<i64: 6, 64>}, {pipeline_mode = #tpu.pipeline_mode<synchronous>, transform_indices = @transform_4, window_bounds = array<i64: 16, 1>}]} {
    %c0_i32 = arith.constant 0 : i32
    %0 = arith.cmpi eq, %arg0, %c0_i32 : i32
    %1 = arith.extui %0 : i1 to i32
    %c0_i32_0 = arith.constant 0 : i32
    %2 = arith.cmpi ne, %1, %c0_i32_0 : i32
    scf.if %2 {
      %cst_9 = arith.constant 0.000000e+00 : f32
      %12 = vector.broadcast %cst_9 : f32 to vector<16x64xf32>
      %c0_10 = arith.constant 0 : index
      %c0_11 = arith.constant 0 : index
      %13 = vector.load %arg6[%c0_10, %c0_11] : memref<16x64xf32, #tpu.memory_space<vmem>>, vector<16x64xf32>
      tpu.vector_store %arg6[%c0_10, %c0_11], %12 {strides = array<i32>} : memref<16x64xf32, #tpu.memory_space<vmem>>, vector<16x64xf32>,
    } else {
    }
    %c0 = arith.constant 0 : index
    %c0_1 = arith.constant 0 : index
    %3 = vector.load %arg6[%c0, %c0_1] : memref<16x64xf32, #tpu.memory_space<vmem>>, vector<16x64xf32>
    %c0_2 = arith.constant 0 : index
    %c0_3 = arith.constant 0 : index
    %4 = vector.load %arg1[%c0_2, %c0_3] : memref<16x128xbf16, #tpu.memory_space<vmem>>, vector<16x128xbf16>
    %c0_4 = arith.constant 0 : index
    %c0_5 = arith.constant 0 : index
    %5 = vector.load %arg2[%c0_4, %c0_5] : memref<128x64xbf16, #tpu.memory_space<vmem>>, vector<128x64xbf16>
    %cst = arith.constant dense<0.000000e+00> : vector<16x64xf32>
    %6 = tpu.matmul %4, %5, %cst {dimension_numbers = #tpu.dot_dimension_numbers<[1], [0], [0], [1], [0, 0, 1, 1], [], []>} : vector<16x128xbf16>, vector<128x64xbf16>, vector<16x64xf32> -> vector<16x64xf32>
    %7 = arith.addf %3, %6 : vector<16x64xf32>
    %c0_6 = arith.constant 0 : index
    %c0_7 = arith.constant 0 : index
    %8 = vector.load %arg6[%c0_6, %c0_7] : memref<16x64xf32, #tpu.memory_space<vmem>>, vector<16x64xf32>
    tpu.vector_store %arg6[%c0_6, %c0_7], %7 {strides = array<i32>} : memref<16x64xf32, #tpu.memory_space<vmem>>, vector<16x64xf32>,
    %c3_i32 = arith.constant 3 : i32
    %9 = arith.cmpi eq, %arg0, %c3_i32 : i32
    %10 = arith.extui %9 : i1 to i32
    %c0_i32_8 = arith.constant 0 : i32
    %11 = arith.cmpi ne, %10, %c0_i32_8 : i32
    scf.if %11 {
      %c0_9 = arith.constant 0 : index
      %c0_10 = arith.constant 0 : index
      %12 = vector.load %arg4[%c0_9, %c0_10] : memref<6x64xf32, #tpu.memory_space<vmem>>, vector<6x64xf32>
      %13 = vector.extract_strided_slice %12 {offsets = [0, 0], sizes = [1, 64], strides = [1, 1]} : vector<6x64xf32> to vector<1x64xf32>
      %14 = vector.extract_strided_slice %12 {offsets = [1, 0], sizes = [1, 64], strides = [1, 1]} : vector<6x64xf32> to vector<1x64xf32>
      %15 = vector.extract_strided_slice %12 {offsets = [2, 0], sizes = [1, 64], strides = [1, 1]} : vector<6x64xf32> to vector<1x64xf32>
      %16 = vector.extract_strided_slice %12 {offsets = [3, 0], sizes = [1, 64], strides = [1, 1]} : vector<6x64xf32> to vector<1x64xf32>
      %17 = vector.extract_strided_slice %12 {offsets = [4, 0], sizes = [1, 64], strides = [1, 1]} : vector<6x64xf32> to vector<1x64xf32>
      %18 = vector.extract_strided_slice %12 {offsets = [5, 0], sizes = [1, 1], strides = [1, 1]} : vector<6x64xf32> to vector<1x1xf32>
      %c0_11 = arith.constant 0 : index
      %c0_12 = arith.constant 0 : index
      %19 = vector.load %arg6[%c0_11, %c0_12] : memref<16x64xf32, #tpu.memory_space<vmem>>, vector<16x64xf32>
      %cst_13 = arith.constant dense<0.000000e+00> : vector<64xf32>
      %20 = vector.multi_reduction <add>, %19, %cst_13 [0] : vector<16x64xf32> to vector<64xf32>
      %21 = vector.shape_cast %20 : vector<64xf32> to vector<1x64xf32>
      %cst_14 = arith.constant 1.600000e+01 : f32
      %22 = vector.broadcast %cst_14 : f32 to vector<1x64xf32>
      %23 = arith.divf %21, %22 : vector<1x64xf32>
      %24 = vector.broadcast %23 : vector<1x64xf32> to vector<16x64xf32>
      %25 = arith.subf %19, %24 : vector<16x64xf32>
      %26 = arith.mulf %25, %25 : vector<16x64xf32>
      %cst_15 = arith.constant dense<0.000000e+00> : vector<64xf32>
      %27 = vector.multi_reduction <add>, %26, %cst_15 [0] : vector<16x64xf32> to vector<64xf32>
      %28 = vector.shape_cast %27 : vector<64xf32> to vector<1x64xf32>
      %cst_16 = arith.constant 1.600000e+01 : f32
      %29 = vector.broadcast %cst_16 : f32 to vector<1x64xf32>
      %30 = arith.divf %28, %29 : vector<1x64xf32>
      %cst_17 = arith.constant 9.99999974E-6 : f32
      %31 = vector.broadcast %cst_17 : f32 to vector<1x64xf32>
      %32 = arith.addf %30, %31 : vector<1x64xf32>
      %33 = math.rsqrt %32 : vector<1x64xf32>
      %34 = arith.mulf %13, %33 : vector<1x64xf32>
      %35 = arith.mulf %23, %34 : vector<1x64xf32>
      %36 = arith.subf %14, %35 : vector<1x64xf32>
      %37 = vector.broadcast %34 : vector<1x64xf32> to vector<16x64xf32>
      %38 = arith.mulf %19, %37 : vector<16x64xf32>
      %39 = vector.broadcast %36 : vector<1x64xf32> to vector<16x64xf32>
      %40 = arith.addf %38, %39 : vector<16x64xf32>
      %cst_18 = arith.constant 0.000000e+00 : f32
      %41 = vector.broadcast %cst_18 : f32 to vector<16x64xf32>
      %42 = arith.cmpf oge, %40, %41 : vector<16x64xf32>
      %cst_19 = arith.constant 2.000000e-01 : f32
      %43 = vector.broadcast %cst_19 : f32 to vector<16x64xf32>
      %44 = arith.mulf %43, %40 : vector<16x64xf32>
      %45 = arith.select %42, %40, %44 : vector<16x64xi1>, vector<16x64xf32>
      %46 = arith.truncf %45 : vector<16x64xf32> to vector<16x64xbf16>
      %c0_20 = arith.constant 0 : index
      %c0_21 = arith.constant 0 : index
      %47 = vector.load %arg3[%c0_20, %c0_21] : memref<64x64xbf16, #tpu.memory_space<vmem>>, vector<64x64xbf16>
      %cst_22 = arith.constant dense<0.000000e+00> : vector<16x64xf32>
      %48 = tpu.matmul %46, %47, %cst_22 {dimension_numbers = #tpu.dot_dimension_numbers<[1], [0], [0], [1], [0, 0, 1, 1], [], []>} : vector<16x64xbf16>, vector<64x64xbf16>, vector<16x64xf32> -> vector<16x64xf32>
      %cst_23 = arith.constant dense<0.000000e+00> : vector<64xf32>
      %49 = vector.multi_reduction <add>, %48, %cst_23 [0] : vector<16x64xf32> to vector<64xf32>
      %50 = vector.shape_cast %49 : vector<64xf32> to vector<1x64xf32>
      %cst_24 = arith.constant 1.600000e+01 : f32
      %51 = vector.broadcast %cst_24 : f32 to vector<1x64xf32>
      %52 = arith.divf %50, %51 : vector<1x64xf32>
      %53 = vector.broadcast %52 : vector<1x64xf32> to vector<16x64xf32>
      %54 = arith.subf %48, %53 : vector<16x64xf32>
      %55 = arith.mulf %54, %54 : vector<16x64xf32>
      %cst_25 = arith.constant dense<0.000000e+00> : vector<64xf32>
      %56 = vector.multi_reduction <add>, %55, %cst_25 [0] : vector<16x64xf32> to vector<64xf32>
      %57 = vector.shape_cast %56 : vector<64xf32> to vector<1x64xf32>
      %cst_26 = arith.constant 1.600000e+01 : f32
      %58 = vector.broadcast %cst_26 : f32 to vector<1x64xf32>
      %59 = arith.divf %57, %58 : vector<1x64xf32>
      %cst_27 = arith.constant 9.99999974E-6 : f32
      %60 = vector.broadcast %cst_27 : f32 to vector<1x64xf32>
      %61 = arith.addf %59, %60 : vector<1x64xf32>
      %62 = math.rsqrt %61 : vector<1x64xf32>
      %63 = arith.mulf %15, %62 : vector<1x64xf32>
      %64 = arith.mulf %52, %63 : vector<1x64xf32>
      %65 = arith.subf %16, %64 : vector<1x64xf32>
      %66 = vector.broadcast %63 : vector<1x64xf32> to vector<16x64xf32>
      %67 = arith.mulf %48, %66 : vector<16x64xf32>
      %68 = vector.broadcast %65 : vector<1x64xf32> to vector<16x64xf32>
      %69 = arith.addf %67, %68 : vector<16x64xf32>
      %cst_28 = arith.constant 0.000000e+00 : f32
      %70 = vector.broadcast %cst_28 : f32 to vector<16x64xf32>
      %71 = arith.cmpf oge, %69, %70 : vector<16x64xf32>
      %cst_29 = arith.constant 2.000000e-01 : f32
      %72 = vector.broadcast %cst_29 : f32 to vector<16x64xf32>
      %73 = arith.mulf %72, %69 : vector<16x64xf32>
      %74 = arith.select %71, %69, %73 : vector<16x64xi1>, vector<16x64xf32>
      %75 = vector.broadcast %17 : vector<1x64xf32> to vector<16x64xf32>
      %76 = arith.mulf %74, %75 : vector<16x64xf32>
      %cst_30 = arith.constant dense<0.000000e+00> : vector<16xf32>
      %77 = vector.multi_reduction <add>, %76, %cst_30 [1] : vector<16x64xf32> to vector<16xf32>
      %78 = vector.shape_cast %77 : vector<16xf32> to vector<16x1xf32>
      %79 = vector.broadcast %18 : vector<1x1xf32> to vector<16x1xf32>
      %80 = arith.addf %78, %79 : vector<16x1xf32>
      %c0_31 = arith.constant 0 : index
      %c0_32 = arith.constant 0 : index
      %81 = vector.load %arg5[%c0_31, %c0_32] : memref<16x1xf32, #tpu.memory_space<vmem>>, vector<16x1xf32>
      tpu.vector_store %arg5[%c0_31, %c0_32], %80 {strides = array<i32>} : memref<16x1xf32, #tpu.memory_space<vmem>>, vector<16x1xf32>,
    } else {
    }
    return
  }
  func.func @transform_0(%arg0: i32) -> (i32, i32) {
    %c0_i32 = arith.constant 0 : i32
    %c0_i32_0 = arith.constant 0 : i32
    return %c0_i32, %arg0 : i32, i32
  }
  func.func @transform_1(%arg0: i32) -> (i32, i32) {
    %c0_i32 = arith.constant 0 : i32
    %c0_i32_0 = arith.constant 0 : i32
    return %arg0, %c0_i32 : i32, i32
  }
  func.func @transform_2(%arg0: i32) -> (i32, i32) {
    %c0_i32 = arith.constant 0 : i32
    %c0_i32_0 = arith.constant 0 : i32
    %c0_i32_1 = arith.constant 0 : i32
    return %c0_i32, %c0_i32_0 : i32, i32
  }
  func.func @transform_3(%arg0: i32) -> (i32, i32) {
    %c0_i32 = arith.constant 0 : i32
    %c0_i32_0 = arith.constant 0 : i32
    %c0_i32_1 = arith.constant 0 : i32
    return %c0_i32, %c0_i32_0 : i32, i32
  }
  func.func @transform_4(%arg0: i32) -> (i32, i32) {
    %c0_i32 = arith.constant 0 : i32
    %c0_i32_0 = arith.constant 0 : i32
    %c0_i32_1 = arith.constant 0 : i32
    return %c0_i32, %c0_i32_0 : i32, i32
  }
}

</mosaic_0001>

<bundles_post_ra>
// kernel: model_forward.1
= control target key start
LH: loop header
LB: loop body
LE: loop exit
PB: predicated region body
PF: predicated region fallthrough
CT: control target
= control target key end

     0   :  { %s803_s15 = smov 0   ;;  %s805_s16 = smov 0   ;;  %s913_s0 = inlined_call_operand.vmem [shape: bf16[16,512], index: 0, kind: input, shape index: {}]   ;;  %s914_s1 = inlined_call_operand.vmem [shape: bf16[512,64], index: 1, kind: input, shape index: {}]   ;;  %s915_s2 = inlined_call_operand.vmem [shape: bf16[64,64], index: 2, kind: input, shape index: {}]   ;;  %s916_s3 = inlined_call_operand.vmem [shape: f32[6,64], index: 3, kind: input, shape index: {}]   ;;  %s917_s4 = inlined_call_operand.vmem [shape: f32[16,1], index: 4, kind: output, shape index: {}]  }
   0x1   :  { %s807_s17 = smov 0  }
   0x2 LB: > { %s816_s18 = sadd.s32 4294967295, %s771_s17   ;;  %s818_s19 = sadd.s32 1, %s771_s17   ;;  %s771_s17 = sphi %s807_s17, %s920_s17   ;;  %s767_s16 = sphi %s805_s16, %s919_s16   ;;  %s763_s15 = sphi %s803_s15, %s918_s15  }
   0x3   : > { %s18_s20 = ssub.s32 %s771_s17, %s818_s19  ;;  %s21_s21 = sadd.s32 1, %s767_s16 }
   0x4   : > { %p19_p0 = scmp.eq.s32.totalorder %s18_s20, 0  ;;  %p28_p1 = scmp.ne.s32.totalorder %s767_s16, %s763_s15 }
   0x5   : > { %p29_p2 = scmp.eq.s32.totalorder %s771_s17, 0  ;;  %p632_p4 = scmp.ge.s32.totalorder %s771_s17, 4 }
   0x6   : > { %s825_s22 = scalar_select %p19_p0, %s767_s16, %s21_s21  }
   0x7   : > { %p30_p3 = por %p29_p2, %p28_p1  ;;  %149 = sbr.rel (%p632_p4) target bundleno = 21 (0x15), region = 24 }
   0xe   : > { %152 = sbr.rel (!%p30_p3) target bundleno = 21 (0x15), region = 28  ;;  %s154_s23 = sand.u32 (%p30_p3), 1, %s767_s16  }
   0xf   : > { %s634_s24 = sshll.u32 (%p30_p3), %s771_s17, 2  ;;  %s633_s25 = sshll.u32 (%p30_p3), %s154_s23, 3 }
  0x10   : > { %s158_s28 = scalar_lea.vmem (%p30_p3), %s913_s0, %s634_s24  ;;  %s156_s29 = scalar_lea.vmem (%p30_p3), [#allocation3], %s633_s25 }
  0x11   : > { %v174_v0 = vld [vmem:[%s158_s28] sm:$0xf] (%p30_p3)  ;;  %v176_v1 = vld [vmem:[%s158_s28 + $0x10] sm:$0xf] (%p30_p3) }
  0x12   : > { %175 = vst [vmem:[%s156_s29] sm:$0xf] (%p30_p3), %v174_v0  ;;  %177 = vst [vmem:[%s156_s29 + $0x4] sm:$0xf] (%p30_p3), %v176_v1 }
  0x15 PF: > { %p635_p5 = scmp.ge.s32.totalorder %s771_s17, 1  ;;  %p212_p6 = scmp.lt.s32.totalorder %s771_s17, 5 }
  0x17   : > { %p213_p7 = pnand %p635_p5, %p212_p6 }
  0x18   : > { %s219_s30 = sand.u32 (!%p213_p7), 1, %s763_s15   ;;  %s637_s5 = sshll.u32 (!%p213_p7), %s816_s18, 4 }
  0x19   : > { %216 = sbr.rel (%p213_p7) target bundleno = 796 (0x31c), region = 73  ;;  %s833_s6 = sshll.u32 (!%p213_p7), %s219_s30, 3 }
  0x1a   : > { %p245_p8 = scmp.lt.s32.totalorder (!%p213_p7), %s637_s5, 63  ;;  %s221_s11 = scalar_lea.vmem (!%p213_p7), [#allocation3], %s833_s6 }
  0x1b   : > { %p639_p9 = scmp.ne.s32.totalorder (!%p213_p7), %s816_s18, 0 }
  0x20   : > { %s922_s5 = smov (!%p245_p8, %s637_s5), 63  ;;  %254 = sbr.rel (%p639_p9) target bundleno = 39 (0x27), region = 81 }
  0x21   : > { %s638_s7 = sshll.u32 %s922_s5, 2  ;;  %vm255_vm0 = vcmask (!%p639_p9), 523264   ;;  %v773_v2 = vmov (!%p639_p9), 0.0  }
  0x22   : > { %s838_s10 = scalar_lea.vmem %s914_s1, %s638_s7  ;;  %256 = vst.msk [vmem:[#allocation2] sm:$0xff] (!%p639_p9), %vm255_vm0, %v773_v2  ;;  %257 = vst.msk [vmem:[#allocation2 + $0x8] sm:$0xff] (!%p639_p9), %vm255_vm0, %v773_v2 }
  0x27 PF: > { %v732_v3 = vld [vmem:[%s838_s10] sm:$0xff]   ;;  %v774_v4 = vmov 0.0   ;;  %v733_v5 = vld [vmem:[%s838_s10 + $0x8] sm:$0xff]   ;;  %vm775_vm1 = vmmov 0   ;;  %v734_v6 = vld [vmem:[%s838_s10 + $0x10] sm:$0xff]   ;;  %vm375_vm2 = vcmask 523264  }
  0x28   : > { %671 = vmatprep.subr.bf16.mxu0 %v774_v4  ;;  %687 = vmatprep.mubr.msk.bf16.mxu0 %vm775_vm1, %v774_v4  ;;  %v735_v7 = vld [vmem:[%s838_s10 + $0x18] sm:$0xff]   ;;  %v736_v8 = vld [vmem:[%s838_s10 + $0x20] sm:$0xff]   ;;  %v737_v9 = vld [vmem:[%s838_s10 + $0x28] sm:$0xff]   ;;  %p649_p10 = scmp.ne.s32.totalorder %s816_s18, 3 }
  0x29   : > { %672 = vmatpush3.bf16.msra.mxu0 %v732_v3  ;;  %v738_v10 = vld [vmem:[%s838_s10 + $0x30] sm:$0xff]   ;;  %v739_v11 = vld [vmem:[%s838_s10 + $0x38] sm:$0xff]   ;;  %v258_v13 = vld [vmem:[#allocation2] sm:$0xff]  ;;  %v776_v22 = vmov (!%p649_p10), 0.0   ;;  %vm777_vm3 = vmmov (!%p649_p10), 0   ;;  %v418_v53 = vlaneseq (!%p649_p10)  ;;  %vm581_vm8 = vcmask (!%p649_p10), 7168  }
  0x2a   : > { %673 = vmatprep.subr.bf16.mxu0 %v774_v4  ;;  %v740_v12 = vld [vmem:[%s221_s11] sm:$0xff]   ;;  %v259_v15 = vld [vmem:[#allocation2 + $0x8] sm:$0xff]  ;;  %v741_v21 = vld [vmem:[%s915_s2] sm:$0xff] (!%p649_p10)  }
  0x2b   : > { %v742_v23 = vld [vmem:[%s915_s2 + $0x8] sm:$0xff] (!%p649_p10)   ;;  %v743_v28 = vld [vmem:[%s915_s2 + $0x10] sm:$0xff] (!%p649_p10)   ;;  %v744_v31 = vld [vmem:[%s915_s2 + $0x18] sm:$0xff] (!%p649_p10)   ;;  %v871_v54 = vshrl.u32 (!%p649_p10), %v418_v53, 7 }
  0x2c   : > { %v876_v55 = vld [vmem:[%s916_s3] sm:$0x3f] (!%p649_p10) }
  0x2d   : > { %674 = vmatpush3.bf16.msra.mxu0 %v733_v5  ;;  %v420_v56 = vsub.s32 (!%p649_p10), 0, %v871_v54  ;;  %v426_v62 = vsub.s32 (!%p649_p10), 1, %v871_v54 }
  0x2e   : > { %675 = vmatprep.subr.bf16.mxu0 %v774_v4 }
  0x31   : > { %676 = vmatpush3.bf16.msra.mxu0 %v734_v6 }
  0x32   : > { %677 = vmatprep.subr.bf16.mxu0 %v774_v4 }
  0x35   : > { %678 = vmatpush3.bf16.msra.mxu0 %v735_v7 }
  0x36   : > { %679 = vmatprep.subr.bf16.mxu0 %v774_v4 }
  0x39   : > { %680 = vmatpush3.bf16.msra.mxu0 %v736_v8 }
  0x3a   : > { %681 = vmatprep.subr.bf16.mxu0 %v774_v4 }
  0x3d   : > { %682 = vmatpush3.bf16.msra.mxu0 %v737_v9 }
  0x3e   : > { %683 = vmatprep.subr.bf16.mxu0 %v774_v4 }
  0x41   : > { %684 = vmatpush3.bf16.msra.mxu0 %v738_v10 }
  0x42   : > { %685 = vmatprep.subr.bf16.mxu0 %v774_v4 }
  0x45   : > { %686 = vmatpush3.bf16.msra.mxu0 %v739_v11 }
  0x46   : > { %691 = vmatprep.subr.bf16.mxu0 (!%p649_p10), %v776_v22 }
  0x48   : > { %688 = vmatmul.mubr.bf16.vlgmr.msra.gmra.mrb[0].mxu0 %v740_v12 }
  0x49   : > { %692 = vmatpush3.bf16.msra.mxu0 (!%p649_p10), %v741_v21  ;;  %699 = vmatprep.mubr.msk.bf16.mxu0 (!%p649_p10), %vm777_vm3, %v776_v22 }
  0x4a   : > { %693 = vmatprep.subr.bf16.mxu0 (!%p649_p10), %v776_v22 }
  0x4d   : > { %694 = vmatpush3.bf16.msra.mxu0 (!%p649_p10), %v742_v23 }
  0x4e   : > { %695 = vmatprep.subr.bf16.mxu0 (!%p649_p10), %v776_v22 }
  0x51   : > { %696 = vmatpush3.bf16.msra.mxu0 (!%p649_p10), %v743_v28 }
  0x52   : > { %697 = vmatprep.subr.bf16.mxu0 (!%p649_p10), %v776_v22 }
  0x55   : > { %698 = vmatpush3.bf16.msra.mxu0 (!%p649_p10), %v744_v31 }
 0x11a   : > { %381 = sbr.rel (%p649_p10) target bundleno = 796 (0x31c), region = 85 }
 0x11b   : > { %v366_v14 = vpop.f32.mrb[0].mxu0 }
 0x11c   : > { %v373_v16 = vadd.f32 %v366_v14, %v258_v13  ;;  %v689_v17 = vpop.f32.mrb[1].mxu0 }
 0x11d   : > { %v369_v18 = vpop.f32.mrb[2].mxu0 }
 0x11e   : > { %376 = vst.msk [vmem:[#allocation2] sm:$0xff] %vm375_vm2, %v373_v16  ;;  %v374_v19 = vadd.f32 %v369_v18, %v259_v15  ;;  %v690_v20 = vpop.f32.mrb[3].mxu0 }
 0x120   : > { %377 = vst.msk [vmem:[#allocation2 + $0x8] sm:$0xff] %vm375_vm2, %v374_v19 }
 0x125   : > { %v383_v24 = vld [vmem:[#allocation2] sm:$0xff] }
 0x126   : > { %v385_v26 = vsel %vm375_vm2, %v383_v24, 0.0 }
 0x127   : > { %v384_v25 = vld [vmem:[#allocation2 + $0x8] sm:$0xff] }
 0x128   : > { %v386_v27 = vsel %vm375_vm2, %v384_v25, 0.0 }
 0x129   : > { %v387_v29 = vadd.f32 %v386_v27, %v385_v26 }
 0x12b   : > { %v388_v30 = vrot.slane %v387_v29, 4 }
 0x12d   : > { %v389_v32 = vadd.f32 %v388_v30, %v387_v29 }
 0x12f   : > { %v390_v33 = vrot.slane %v389_v32, 2 }
 0x131   : > { %v391_v34 = vadd.f32 %v390_v33, %v389_v32 }
 0x133   : > { %v392_v35 = vrot.slane %v391_v34, 1 }
 0x135   : > { %v393_v36 = vadd.f32 %v392_v35, %v391_v34 }
 0x137   : > { %v395_v37 = vmul.f32 0.0625, %v393_v36 }
 0x139   : > { %v396_v38 = vsub.f32 %v383_v24, %v395_v37  ;;  %v397_v39 = vsub.f32 %v384_v25, %v395_v37 }
 0x13b   : > { %v398_v40 = vmul.f32 %v396_v38, %v396_v38  ;;  %v399_v41 = vmul.f32 %v397_v39, %v397_v39  ;;  %v547_v39 = vsub.s32 2, %v871_v54 }
 0x13d   : > { %v400_v42 = vsel %vm375_vm2, %v398_v40, 0.0  ;;  %v401_v43 = vsel %vm375_vm2, %v399_v41, 0.0 }
 0x13e   : > { %v402_v44 = vadd.f32 %v401_v43, %v400_v42 }
 0x140   : > { %v403_v45 = vrot.slane %v402_v44, 4 }
 0x142   : > { %v404_v46 = vadd.f32 %v403_v45, %v402_v44 }
 0x144   : > { %v405_v47 = vrot.slane %v404_v46, 2 }
 0x146   : > { %v406_v48 = vadd.f32 %v405_v47, %v404_v46  ;;  %v553_v47 = vsub.s32 3, %v871_v54 }
 0x148   : > { %v407_v49 = vrot.slane %v406_v48, 1 }
 0x14a   : > { %v408_v50 = vadd.f32 %v407_v49, %v406_v48  ;;  %v565_v49 = vsub.s32 4, %v871_v54 }
 0x14c   : > { %v409_v51 = vmul.f32 0.0625, %v408_v50  ;;  %v566_v53 = vrot.slane %v876_v55, %v565_v49 }
 0x14e   : > { %v410_v52 = vadd.f32 1e-05, %v409_v51 }
 0x150   : > { %745 = vrsqrt.f32 %v410_v52 }
 0x15a   : > { %v746_v57 = vpop.eup %745 }
 0x15b   : > { %v412_v58 = vmul.f32 %v746_v57, %v876_v55 }
 0x15d   : > { %v413_v59 = vmul.f32 %v412_v58, %v395_v37  ;;  %v421_v60 = vrot.slane %v412_v58, %v420_v56 }
 0x15f   : > { %v415_v61 = vrot.slane %v413_v59, 7  ;;  %v422_v0 = vmul.f32 %v421_v60, %v383_v24  ;;  %v423_v1 = vmul.f32 %v421_v60, %v384_v25 }
 0x161   : > { %v417_v63 = vsub.f32 %v876_v55, %v415_v61 }
 0x163   : > { %v427_v2 = vrot.slane %v417_v63, %v426_v62 }
 0x165   : > { %v428_v3 = vadd.f32 %v427_v2, %v422_v0  ;;  %v429_v4 = vadd.f32 %v427_v2, %v423_v1  ;;  %v577_v0 = vsub.s32 5, %v871_v54 }
 0x167   : > { %vm430_vm4 = vcmp.ge.f32.partialorder %v428_v3, 0.0  ;;  %vm431_vm5 = vcmp.ge.f32.partialorder %v429_v4, 0.0  ;;  %v432_v5 = vmul.f32 0.2, %v428_v3  ;;  %v433_v6 = vmul.f32 0.2, %v429_v4 }
 0x168   : > { %v578_v1 = vrot.slane %v876_v55, %v577_v0 }
 0x169   : > { %v434_v7 = vsel %vm430_vm4, %v428_v3, %v432_v5  ;;  %v435_v8 = vsel %vm431_vm5, %v429_v4, %v433_v6 }
 0x16a   : > { %v436_v9 = vpack.c.bf16 %v435_v8, %v434_v7 }
 0x16c   : > { %700 = vmatmul.mubr.msk.bf16.vlgmr.msra.gmra.mrb[0].mxu0 %vm375_vm2, %v436_v9 }
 0x23f   : > { %v506_v10 = vpop.f32.mrb[0].mxu0 }
 0x240   : > { %v701_v11 = vpop.f32.mrb[1].mxu0  ;;  %v513_v13 = vsel %vm375_vm2, %v506_v10, 0.0 }
 0x241   : > { %v509_v12 = vpop.f32.mrb[2].mxu0 }
 0x242   : > { %v514_v14 = vsel %vm375_vm2, %v509_v12, 0.0  ;;  %v702_v15 = vpop.f32.mrb[3].mxu0 }
 0x243   : > { %v515_v16 = vadd.f32 %v514_v14, %v513_v13 }
 0x245   : > { %v516_v17 = vrot.slane %v515_v16, 4 }
 0x247   : > { %v517_v18 = vadd.f32 %v516_v17, %v515_v16 }
 0x249   : > { %v518_v19 = vrot.slane %v517_v18, 2 }
 0x24b   : > { %v519_v20 = vadd.f32 %v518_v19, %v517_v18 }
 0x24d   : > { %v520_v21 = vrot.slane %v519_v20, 1 }
 0x24f   : > { %v521_v22 = vadd.f32 %v520_v21, %v519_v20 }
 0x251   : > { %v522_v23 = vmul.f32 0.0625, %v521_v22 }
 0x253   : > { %v523_v24 = vsub.f32 %v506_v10, %v522_v23  ;;  %v524_v25 = vsub.f32 %v509_v12, %v522_v23 }
 0x255   : > { %v525_v26 = vmul.f32 %v523_v24, %v523_v24  ;;  %v526_v27 = vmul.f32 %v524_v25, %v524_v25 }
 0x257   : > { %v527_v28 = vsel %vm375_vm2, %v525_v26, 0.0  ;;  %v528_v29 = vsel %vm375_vm2, %v526_v27, 0.0 }
 0x258   : > { %v529_v30 = vadd.f32 %v528_v29, %v527_v28 }
 0x25a   : > { %v530_v31 = vrot.slane %v529_v30, 4 }
 0x25c   : > { %v531_v32 = vadd.f32 %v530_v31, %v529_v30 }
 0x25e   : > { %v532_v33 = vrot.slane %v531_v32, 2 }
 0x260   : > { %v533_v34 = vadd.f32 %v532_v33, %v531_v32 }
 0x262   : > { %v534_v35 = vrot.slane %v533_v34, 1 }
 0x264   : > { %v535_v36 = vadd.f32 %v534_v35, %v533_v34 }
 0x266   : > { %v536_v37 = vmul.f32 0.0625, %v535_v36 }
 0x268   : > { %v537_v38 = vadd.f32 1e-05, %v536_v37 }
 0x26a   : > { %747 = vrsqrt.f32 %v537_v38 }
 0x274   : > { %v748_v40 = vpop.eup %747 }
 0x275   : > { %v539_v41 = vmul.f32 %v748_v40, %v876_v55 }
 0x277   : > { %v540_v42 = vmul.f32 %v539_v41, %v522_v23  ;;  %v548_v43 = vrot.slane %v539_v41, %v547_v39 }
 0x279   : > { %v542_v44 = vrot.slane %v540_v42, 7  ;;  %v549_v45 = vmul.f32 %v548_v43, %v506_v10  ;;  %v550_v46 = vmul.f32 %v548_v43, %v509_v12 }
 0x27b   : > { %v544_v48 = vsub.f32 %v876_v55, %v542_v44 }
 0x27d   : > { %v554_v50 = vrot.slane %v544_v48, %v553_v47 }
 0x27f   : > { %v556_v51 = vadd.f32 %v554_v50, %v550_v46  ;;  %v555_v52 = vadd.f32 %v554_v50, %v549_v45 }
 0x281   : > { %vm557_vm6 = vcmp.ge.f32.partialorder %v555_v52, 0.0  ;;  %v559_v56 = vmul.f32 0.2, %v555_v52  ;;  %vm558_vm7 = vcmp.ge.f32.partialorder %v556_v51, 0.0  ;;  %v560_v57 = vmul.f32 0.2, %v556_v51 }
 0x283   : > { %v561_v58 = vsel %vm557_vm6, %v555_v52, %v559_v56  ;;  %v562_v59 = vsel %vm558_vm7, %v556_v51, %v560_v57 }
 0x284   : > { %v567_v60 = vmul.f32 %v566_v53, %v561_v58  ;;  %v568_v62 = vmul.f32 %v566_v53, %v562_v59 }
 0x286   : > { %v569_v61 = vsel %vm375_vm2, %v567_v60, 0.0  ;;  %v572_v63 = vsel %vm375_vm2, %v568_v62, 0.0 }
 0x287   : > { %570 = vadd.xlane.f32.xlu0 %v569_v61 }
 0x28b   : > { %573 = vadd.xlane.f32.xlu0 %v572_v63 }
 0x314   : > { %v571_v2 = vpop.xlane.xlu0 %570 }
 0x315   : > { %v579_v3 = vadd.f32 %v578_v1, %v571_v2 }
 0x317   : > { %582 = vst.msk [vmem:[%s917_s4] sm:$0xff] %vm581_vm8, %v579_v3 }
 0x318   : > { %v574_v4 = vpop.xlane.xlu0 %573 }
 0x319   : > { %v580_v5 = vadd.f32 %v578_v1, %v574_v4 }
 0x31b   : > { %583 = vst.msk [vmem:[%s917_s4 + $0x8] sm:$0xff] %vm581_vm8, %v580_v5 }
 0x31c PF: > { %p11_p11 = scmp.ge.s32.totalorder %s818_s19, 6   ;;  %s918_s15 = smov %s767_s16 }
 0x31d   : > { %s919_s16 = smov %s825_s22  ;;  %s920_s17 = smov %s818_s19 }
 0x31e   :  { %13 = sbr.rel (!%p11_p11) target bundleno = 2 (0x2), region = 119 }

</bundles_post_ra>
